<compile_context>
chip_gen: v7x
topology: tpu7x:2x2x1
jax: 0.10.0
libtpu: 0.0.40
codegen_flags: <defaults>
</compile_context>

<pallas_src>
import jax
import jax.numpy as jnp
from jax.experimental import pallas as pl
from jax.experimental.pallas import tpu as pltpu

HIDDEN_NEURONS = 10
NUM_FEATURES = 10   # X.shape[1] for the rice-classification table (all cols but the label)


def rice_kernel(b_ref, x_ref, w_ref, o_ref):
    """One batch tile: o = sigmoid(x @ w_fused + b_fused).

    b_ref: (1,)    f32 SMEM  fused bias (scalar)
    x_ref: (TB, F) f32 VMEM  input rows (batch on sublanes, features on lanes)
    w_ref: (F, 1)  f32 VMEM  fused weight column
    o_ref: (TB, 1) f32 VMEM  per-row probability
    """
    z = jnp.dot(x_ref[...], w_ref[...], preferred_element_type=jnp.float32) + b_ref[0]
    # sigmoid = 1 / (1 + exp(-z)): EUP exp + EUP approx reciprocal (off the VPU/MXU path)
    o_ref[...] = pl.reciprocal(1.0 + jnp.exp(-z), approx=True)


def rice_model(x, w1, b1, w2, b2, *, tb=8192):
    """Forward pass of RiceModel. x: (B, F) float32. Returns (B, 1) float32."""
    B, F = x.shape
    x = x.astype(jnp.float32)

    # Exact algebraic fusion of the two Linear layers (no nonlinearity between them):
    #   (x @ w1 + b1) @ w2 + b2  ==  x @ (w1 @ w2) + (b1 @ w2 + b2)
    w_fused = (w1 @ w2).reshape(F, 1).astype(jnp.float32)     # (F, 1)
    b_fused = (b1 @ w2 + b2).reshape(1).astype(jnp.float32)   # (1,)

    # Sublane (second-to-last) block dim must be a multiple of 8; pad rows only if needed.
    b_run = B
    if B % 8 != 0:
        b_run = pl.cdiv(B, 8) * 8
        x = jnp.pad(x, ((0, b_run - B), (0, 0)))
    tb = max(8, min(tb - tb % 8, b_run))          # multiple of 8, never larger than the batch
    grid = (pl.cdiv(b_run, tb),)                  # partial last tile handled by Pallas

    out = pl.pallas_call(
        rice_kernel,
        out_shape=jax.ShapeDtypeStruct((b_run, 1), jnp.float32),
        grid_spec=pltpu.PrefetchScalarGridSpec(
            num_scalar_prefetch=0,
            grid=grid,
            in_specs=[
                pl.BlockSpec(memory_space=pltpu.SMEM),        # b_fused (1,) -> SMEM scalar
                pl.BlockSpec((tb, F), lambda i: (i, 0)),      # x tile, auto double-buffered
                pl.BlockSpec((F, 1), lambda i: (0, 0)),       # fused weight column, resident
            ],
            out_specs=pl.BlockSpec((tb, 1), lambda i: (i, 0)),
        ),
        compiler_params=pltpu.CompilerParams(
            dimension_semantics=("parallel",),                # shard batch tiles across TCs
            vmem_limit_bytes=32 * 1024 * 1024,
        ),
    )(b_fused, x, w_fused)

    return out[:B] if b_run != B else out


def init_params(key, in_features, hidden):
    # Deterministic init mimicking nn.Linear's uniform(-1/sqrt(fan_in), 1/sqrt(fan_in)).
    k1, k2, k3, k4 = jax.random.split(key, 4)
    bound1 = 1.0 / jnp.sqrt(jnp.float32(in_features))
    bound2 = 1.0 / jnp.sqrt(jnp.float32(hidden))
    # Stored as (in, out) = torch weight transposed.
    w1 = jax.random.uniform(k1, (in_features, hidden), jnp.float32, -bound1, bound1)
    b1 = jax.random.uniform(k2, (1, hidden), jnp.float32, -bound1, bound1)
    w2 = jax.random.uniform(k3, (hidden, 1), jnp.float32, -bound2, bound2)
    b2 = jax.random.uniform(k4, (1, 1), jnp.float32, -bound2, bound2)
    return w1, b1, w2, b2


if __name__ == "__main__":
    key = jax.random.PRNGKey(0)
    kx, kp = jax.random.split(key)

    batch = 8
    x = jax.random.normal(kx, (batch, NUM_FEATURES), jnp.float32)
    w1, b1, w2, b2 = init_params(kp, NUM_FEATURES, HIDDEN_NEURONS)

    fwd = jax.jit(rice_model)
    out = jax.block_until_ready(fwd(x, w1, b1, w2, b2))

    # Pure-JAX reference of the UNFUSED PyTorch forward: sigmoid(Linear2(Linear1(x)))
    ref = jax.nn.sigmoid((x @ w1 + b1) @ w2 + b2)
    assert out.shape == (batch, 1)
    # Slightly loose tolerance: EUP approx reciprocal + wrapper-side weight-fusion rounding.
    assert jnp.allclose(out, ref, atol=2e-3, rtol=2e-3)

    print("KERNEL_OK")
</pallas_src>

<mosaic_0001>
module attributes {stable_mosaic.version = 11 : i64} {
  func.func @rice_kernel(%arg0: i32, %arg1: memref<1xf32, #tpu.memory_space<smem>>, %arg2: memref<8x10xf32, #tpu.memory_space<vmem>>, %arg3: memref<10x1xf32, #tpu.memory_space<vmem>>, %arg4: memref<8x1xf32, #tpu.memory_space<vmem>>) attributes {dimension_semantics = [#tpu.dimension_semantics<parallel>], iteration_bounds = array<i64: 1>, scalar_prefetch = 0 : i64, scratch_operands = 0 : i64, tpu.core_type = #tpu.core_type<tc>, window_params = [{transform_indices = @transform_0, window_bounds = array<i64: 1>}, {transform_indices = @transform_1, window_bounds = array<i64: 8, 10>}, {pipeline_mode = #tpu.pipeline_mode<synchronous>, transform_indices = @transform_2, window_bounds = array<i64: 10, 1>}, {transform_indices = @transform_3, window_bounds = array<i64: 8, 1>}]} {
    %c0 = arith.constant 0 : index
    %c0_0 = arith.constant 0 : index
    %0 = vector.load %arg2[%c0, %c0_0] : memref<8x10xf32, #tpu.memory_space<vmem>>, vector<8x10xf32>
    %c0_1 = arith.constant 0 : index
    %c0_2 = arith.constant 0 : index
    %1 = vector.load %arg3[%c0_1, %c0_2] : memref<10x1xf32, #tpu.memory_space<vmem>>, vector<10x1xf32>
    %cst = arith.constant dense<0.000000e+00> : vector<8x1xf32>
    %2 = tpu.matmul %0, %1, %cst {dimension_numbers = #tpu.dot_dimension_numbers<[1], [0], [0], [1], [0, 0, 1, 1], [], []>} : vector<8x10xf32>, vector<10x1xf32>, vector<8x1xf32> -> vector<8x1xf32>
    %c0_3 = arith.constant 0 : index
    %3 = memref.load %arg1[%c0_3] : memref<1xf32, #tpu.memory_space<smem>>
    %4 = vector.broadcast %3 : f32 to vector<8x1xf32>
    %5 = arith.addf %2, %4 : vector<8x1xf32>
    %cst_4 = arith.constant 0.000000e+00 : f32
    %6 = vector.broadcast %cst_4 : f32 to vector<8x1xf32>
    %7 = arith.subf %6, %5 : vector<8x1xf32>
    %8 = math.exp %7 : vector<8x1xf32>
    %cst_5 = arith.constant 1.000000e+00 : f32
    %9 = vector.broadcast %cst_5 : f32 to vector<8x1xf32>
    %10 = arith.addf %9, %8 : vector<8x1xf32>
    %11 = tpu.reciprocal %10 {approx = true} : vector<8x1xf32> -> vector<8x1xf32>
    %c0_6 = arith.constant 0 : index
    %c0_7 = arith.constant 0 : index
    %12 = vector.load %arg4[%c0_6, %c0_7] : memref<8x1xf32, #tpu.memory_space<vmem>>, vector<8x1xf32>
    tpu.vector_store %arg4[%c0_6, %c0_7], %11 {strides = array<i32>} : memref<8x1xf32, #tpu.memory_space<vmem>>, vector<8x1xf32>,
    return
  }
  func.func @transform_0(%arg0: i32) -> i32 {
    %c0_i32 = arith.constant 0 : i32
    %c0_i32_0 = arith.constant 0 : i32
    return %c0_i32 : i32
  }
  func.func @transform_1(%arg0: i32) -> (i32, i32) {
    %c0_i32 = arith.constant 0 : i32
    %c0_i32_0 = arith.constant 0 : i32
    return %arg0, %c0_i32 : i32, i32
  }
  func.func @transform_2(%arg0: i32) -> (i32, i32) {
    %c0_i32 = arith.constant 0 : i32
    %c0_i32_0 = arith.constant 0 : i32
    %c0_i32_1 = arith.constant 0 : i32
    return %c0_i32, %c0_i32_0 : i32, i32
  }
  func.func @transform_3(%arg0: i32) -> (i32, i32) {
    %c0_i32 = arith.constant 0 : i32
    %c0_i32_0 = arith.constant 0 : i32
    return %arg0, %c0_i32 : i32, i32
  }
}

</mosaic_0001>

<bundles_post_ra>
// kernel: rice_model.1
= control target key start
LH: loop header
LB: loop body
LE: loop exit
PB: predicated region body
PF: predicated region fallthrough
CT: control target
= control target key end

     0   :  { %vm24_vm0 = vcmask 1041408   ;;  %v133_v0 = vmov 0.0|0.0   ;;  %vm134_vm1 = vmmov 1   ;;  %vm135_vm3 = vmmov 0   ;;  %s172_s2 = inlined_call_operand.vmem [shape: f32[10,1], index: 2, kind: input, shape index: {}]   ;;  %s173_s1 = inlined_call_operand.vmem [shape: f32[8,10], index: 1, kind: input, shape index: {}]   ;;  %s174_s0 = inlined_call_operand.<no memory space> [shape: f32[1], index: 0, kind: input, shape index: {}]   ;;  %s175_s3 = inlined_call_operand.vmem [shape: f32[8,1], index: 3, kind: output, shape index: {}]  }
   0x1   :  { %121 = vmatprep.subr.bf16.mxu0 %v133_v0  ;;  %v16_v1 = vld [vmem:[%s172_s2] sm:$0xff]  ;;  %v17_v2 = vld [vmem:[%s172_s2 + $0x8] sm:$0x3]  ;;  %vm123_vm2 = vmpackc.low %vm24_vm0, %vm134_vm1  ;;  %v136_v4 = vmov 0.0   ;;  %vm20_vm4 = vcmask 80896   ;;  %v19_v6 = vstv %s174_s0  ;;  %vm103_vm5 = vcmask 7168  }
   0x2   :  { %v122_v3 = vpack.c.bf16 %v17_v2, %v16_v1  ;;  %118 = vmatprep.mubr.msk.f32.mxu0 %vm135_vm3, %v136_v4  ;;  %v15_v5 = vld [vmem:[%s173_s1] sm:$0xff] }
   0x4   :  { %124 = vmatpush3.bf16.msk.msra.mxu0 %vm123_vm2, %v122_v3 }
   0x7   :  { %119 = vmatmul.mubr.msk.f32.vlgmr.msra.gmra.mrb[0].mxu0 %vm20_vm4, %v15_v5 }
  0xda   :  { %v94_v7 = vpop.f32.mrb[0].mxu0 }
  0xdb   :  { %v95_v8 = vadd.f32 %v94_v7, %v19_v6  ;;  %v120_v9 = vpop.f32.mrb[1].mxu0 }
  0xdd   :  { %v98_v10 = vsub.f32 0.0, %v95_v8 }
  0xdf   :  { %v99_v11 = vmul.f32 1.442695, %v98_v10 }
  0xe1   :  { %129 = vpow2.f32 %v99_v11 }
  0xeb   :  { %v130_v12 = vpop.eup %129 }
  0xec   :  { %v101_v13 = vadd.f32 1.0, %v130_v12 }
  0xee   :  { %131 = vrcp.f32 %v101_v13 }
  0xf8   :  { %v132_v14 = vpop.eup %131 }
  0xf9   :  { %104 = vst.msk [vmem:[%s175_s3] sm:$0xff] %vm103_vm5, %v132_v14 }

</bundles_post_ra>
